<compile_context>
chip_gen: v7x
topology: tpu7x:2x2x1
jax: 0.10.0
libtpu: 0.0.40
codegen_flags: <defaults>
</compile_context>

<pallas_src>
from functools import partial

import jax
import jax.numpy as jnp
from jax import lax
from jax.experimental import pallas as pl
from jax.experimental.pallas import tpu as pltpu


# ----------------------------------------------------------------------------
# Fused kernel: 3x3 conv (stride 1, pad 1) for one row-strip of one image,
# written channels-major (lane-dense).
# ----------------------------------------------------------------------------
def _conv3x3_ps_kernel(x_ref, w_ref, b_ref, o_ref, xp_ref, *, H, W, Cin, SH):
    # x_ref : (1, H, W, Cin)    full NHWC image for this batch element
    # w_ref : (Cout, 9*Cin)     weights, K ordered (ky, kx, ci)
    # b_ref : (Cout, 1)
    # o_ref : (1, Cout, SH*W)   conv output strip, channels-major (lane-dense)
    # xp_ref: (H+2, W+2, Cin)   zero-padded image scratch (rebuilt every step)
    s = pl.program_id(1)
    row0 = pl.multiple_of(s * SH, SH)

    # Build the zero-padded image in VMEM: halo handled in-kernel, no wrapper pad.
    xp_ref[...] = jnp.zeros_like(xp_ref)
    xp_ref[1:H + 1, 1:W + 1, :] = x_ref[0]

    # im2col-lite: gather the 9 shifted (SH, W, Cin) slabs ONCE (tap-major K).
    # H is the untiled major axis -> the dynamic row slice is cheap; the kx shift
    # costs one small relayout per tap, feeding a single matmul (not 9 accumulations).
    slabs = []
    for ky in range(3):
        for kx in range(3):
            slab = xp_ref[pl.ds(row0 + ky, SH), kx:kx + W, :]   # (SH, W, Cin)
            slabs.append(slab.reshape(SH * W, Cin))             # W % 8 == 0 -> cheap
    patches = jnp.concatenate(slabs, axis=1)                    # (SH*W, 9*Cin)

    # Single MXU matmul, contraction depth K = 9*Cin; output lanes = SH*W (dense).
    y = lax.dot_general(w_ref[...], patches,
                        dimension_numbers=(((1,), (1,)), ((), ())),
                        preferred_element_type=jnp.float32)     # (Cout, SH*W)
    y = y + b_ref[...]                                          # (Cout, 1) broadcast
    o_ref[0] = y.astype(o_ref.dtype)


def _pick_strip_height(H, W):
    # Prefer strips whose flattened width SH*W is a multiple of 128 (lane-dense).
    for sh in (8, 16, 32, 4, 2):
        if H % sh == 0 and (sh * W) % 128 == 0:
            return sh
    return H


# ----------------------------------------------------------------------------
# Forward wrapper: NCHW in -> NCHW out (PyTorch semantics)
# ----------------------------------------------------------------------------
def pixel_shuffle_direct_forward(params, x_nchw, scale):
    """x: (N, num_feat, H, W) -> (N, num_out_ch, H*scale, W*scale)."""
    w_oihw, b = params                       # (Cout, Cin, 3, 3), (Cout,)
    N, Cin, H, W = x_nchw.shape
    Cout = w_oihw.shape[0]
    SH = _pick_strip_height(H, W)

    # Tiny layout plumbing (one small XLA op each); all heavy work is in the kernel.
    x_nhwc = jnp.transpose(x_nchw, (0, 2, 3, 1))
    w_mat = jnp.transpose(w_oihw, (0, 2, 3, 1)).reshape(Cout, 9 * Cin)  # K=(ky,kx,ci)
    b_col = b.reshape(Cout, 1)

    kernel = partial(_conv3x3_ps_kernel, H=H, W=W, Cin=Cin, SH=SH)
    y = pl.pallas_call(
        kernel,
        out_shape=jax.ShapeDtypeStruct((N, Cout, H * W), x_nchw.dtype),
        grid=(N, H // SH),
        in_specs=[
            pl.BlockSpec((1, H, W, Cin), lambda n, s: (n, 0, 0, 0)),  # fetched once per n
            pl.BlockSpec((Cout, 9 * Cin), lambda n, s: (0, 0)),       # fetched once
            pl.BlockSpec((Cout, 1), lambda n, s: (0, 0)),
        ],
        out_specs=pl.BlockSpec((1, Cout, SH * W), lambda n, s: (n, 0, s)),
        scratch_shapes=[pltpu.VMEM((H + 2, W + 2, Cin), x_nchw.dtype)],
        compiler_params=pltpu.CompilerParams(
            dimension_semantics=("parallel", "parallel")),
    )(x_nhwc, w_mat, b_col)

    # PixelShuffle(scale): (N, C*r*r, H, W) -> (N, C, H*r, W*r) on the tiny,
    # lane-dense kernel output (cheap reshape/transpose, no conv-sized HBM traffic).
    r = scale
    C = Cout // (r * r)
    y = y.reshape(N, C, r, r, H, W)           # [n, c, r1, r2, h, w]
    y = y.transpose(0, 1, 4, 2, 5, 3)         # [n, c, h, r1, w, r2]
    return y.reshape(N, C, H * r, W * r)


# ----------------------------------------------------------------------------
# Pure-JAX reference (matches PyTorch Conv2d + PixelShuffle exactly)
# ----------------------------------------------------------------------------
def _ref_forward(params, x_nchw, scale):
    w, b = params
    y = lax.conv_general_dilated(
        x_nchw, w, window_strides=(1, 1), padding=((1, 1), (1, 1)),
        dimension_numbers=("NCHW", "OIHW", "NCHW"))
    y = y + b[None, :, None, None]
    N, C4, H, W = y.shape
    r = scale
    C = C4 // (r * r)
    y = y.reshape(N, C, r, r, H, W).transpose(0, 1, 4, 2, 5, 3)
    return y.reshape(N, C, H * r, W * r)


if __name__ == "__main__":
    scale, num_feat, num_out_ch = 4, 32, 3            # Conv: 32 -> 48, then shuffle x4
    N, H, W = 2, 16, 16
    Cout = scale ** 2 * num_out_ch

    key = jax.random.PRNGKey(0)
    kx, kw, kb = jax.random.split(key, 3)
    x = jax.random.normal(kx, (N, num_feat, H, W), jnp.float32)        # NCHW, like PyTorch
    w = jax.random.normal(kw, (Cout, num_feat, 3, 3), jnp.float32) * 0.05
    b = jax.random.normal(kb, (Cout,), jnp.float32) * 0.05
    params = (w, b)

    fwd = jax.jit(partial(pixel_shuffle_direct_forward, scale=scale))
    out = jax.block_until_ready(fwd(params, x))
    assert out.shape == (N, num_out_ch, H * scale, W * scale), out.shape

    ref = jax.block_until_ready(_ref_forward(params, x, scale))
    max_err = float(jnp.max(jnp.abs(out - ref)))
    assert jnp.allclose(out, ref, atol=1e-3, rtol=1e-3), max_err

    print("KERNEL_OK")
</pallas_src>

<mosaic_0001>
module attributes {stable_mosaic.version = 11 : i64} {
  func.func @_conv3x3_ps_kernel(%arg0: i32, %arg1: i32, %arg2: memref<1x16x16x32xf32, #tpu.memory_space<vmem>>, %arg3: memref<48x288xf32, #tpu.memory_space<vmem>>, %arg4: memref<48x1xf32, #tpu.memory_space<vmem>>, %arg5: memref<1x48x128xf32, #tpu.memory_space<vmem>>, %arg6: memref<18x18x32xf32, #tpu.memory_space<vmem>>) attributes {dimension_semantics = [#tpu.dimension_semantics<parallel>, #tpu.dimension_semantics<parallel>], iteration_bounds = array<i64: 2, 2>, scalar_prefetch = 0 : i64, scratch_operands = 1 : i64, tpu.core_type = #tpu.core_type<tc>, window_params = [{transform_indices = @transform_0, window_bounds = array<i64: 1, 16, 16, 32>}, {pipeline_mode = #tpu.pipeline_mode<synchronous>, transform_indices = @transform_1, window_bounds = array<i64: 48, 288>}, {pipeline_mode = #tpu.pipeline_mode<synchronous>, transform_indices = @transform_2, window_bounds = array<i64: 48, 1>}, {transform_indices = @transform_3, window_bounds = array<i64: 1, 48, 128>}]} {
    %c8_i32 = arith.constant 8 : i32
    %0 = arith.muli %arg1, %c8_i32 : i32
    %1 = tpu.assume_multiple %0, 8 : i32
    %cst = arith.constant 0.000000e+00 : f32
    %2 = vector.broadcast %cst : f32 to vector<18x18x32xf32>
    %c0 = arith.constant 0 : index
    %c0_0 = arith.constant 0 : index
    %c0_1 = arith.constant 0 : index
    %3 = vector.load %arg6[%c0, %c0_0, %c0_1] : memref<18x18x32xf32, #tpu.memory_space<vmem>>, vector<18x18x32xf32>
    tpu.vector_store %arg6[%c0, %c0_0, %c0_1], %2 {strides = array<i32>} : memref<18x18x32xf32, #tpu.memory_space<vmem>>, vector<18x18x32xf32>,
    %c0_2 = arith.constant 0 : index
    %c0_3 = arith.constant 0 : index
    %c0_4 = arith.constant 0 : index
    %c0_5 = arith.constant 0 : index
    %4 = vector.load %arg2[%c0_2, %c0_3, %c0_4, %c0_5] : memref<1x16x16x32xf32, #tpu.memory_space<vmem>>, vector<1x16x16x32xf32>
    %5 = vector.shape_cast %4 : vector<1x16x16x32xf32> to vector<16x16x32xf32>
    %c1 = arith.constant 1 : index
    %c1_6 = arith.constant 1 : index
    %c0_7 = arith.constant 0 : index
    %6 = vector.load %arg6[%c1, %c1_6, %c0_7] : memref<18x18x32xf32, #tpu.memory_space<vmem>>, vector<16x16x32xf32>
    tpu.vector_store %arg6[%c1, %c1_6, %c0_7], %5 {strides = array<i32>} : memref<18x18x32xf32, #tpu.memory_space<vmem>>, vector<16x16x32xf32>,
    %c0_i32 = arith.constant 0 : i32
    %7 = arith.addi %1, %c0_i32 : i32
    %8 = arith.index_cast %7 : i32 to index
    %c0_8 = arith.constant 0 : index
    %c0_9 = arith.constant 0 : index
    %9 = vector.load %arg6[%8, %c0_8, %c0_9] : memref<18x18x32xf32, #tpu.memory_space<vmem>>, vector<8x16x32xf32>
    %10 = vector.shape_cast %9 : vector<8x16x32xf32> to vector<128x32xf32>
    %c0_i32_10 = arith.constant 0 : i32
    %11 = arith.addi %1, %c0_i32_10 : i32
    %12 = arith.index_cast %11 : i32 to index
    %c1_11 = arith.constant 1 : index
    %c0_12 = arith.constant 0 : index
    %13 = vector.load %arg6[%12, %c1_11, %c0_12] : memref<18x18x32xf32, #tpu.memory_space<vmem>>, vector<8x16x32xf32>
    %14 = vector.shape_cast %13 : vector<8x16x32xf32> to vector<128x32xf32>
    %c0_i32_13 = arith.constant 0 : i32
    %15 = arith.addi %1, %c0_i32_13 : i32
    %16 = arith.index_cast %15 : i32 to index
    %c2 = arith.constant 2 : index
    %c0_14 = arith.constant 0 : index
    %17 = vector.load %arg6[%16, %c2, %c0_14] : memref<18x18x32xf32, #tpu.memory_space<vmem>>, vector<8x16x32xf32>
    %18 = vector.shape_cast %17 : vector<8x16x32xf32> to vector<128x32xf32>
    %c1_i32 = arith.constant 1 : i32
    %19 = arith.addi %1, %c1_i32 : i32
    %20 = arith.index_cast %19 : i32 to index
    %c0_15 = arith.constant 0 : index
    %c0_16 = arith.constant 0 : index
    %21 = vector.load %arg6[%20, %c0_15, %c0_16] : memref<18x18x32xf32, #tpu.memory_space<vmem>>, vector<8x16x32xf32>
    %22 = vector.shape_cast %21 : vector<8x16x32xf32> to vector<128x32xf32>
    %c1_i32_17 = arith.constant 1 : i32
    %23 = arith.addi %1, %c1_i32_17 : i32
    %24 = arith.index_cast %23 : i32 to index
    %c1_18 = arith.constant 1 : index
    %c0_19 = arith.constant 0 : index
    %25 = vector.load %arg6[%24, %c1_18, %c0_19] : memref<18x18x32xf32, #tpu.memory_space<vmem>>, vector<8x16x32xf32>
    %26 = vector.shape_cast %25 : vector<8x16x32xf32> to vector<128x32xf32>
    %c1_i32_20 = arith.constant 1 : i32
    %27 = arith.addi %1, %c1_i32_20 : i32
    %28 = arith.index_cast %27 : i32 to index
    %c2_21 = arith.constant 2 : index
    %c0_22 = arith.constant 0 : index
    %29 = vector.load %arg6[%28, %c2_21, %c0_22] : memref<18x18x32xf32, #tpu.memory_space<vmem>>, vector<8x16x32xf32>
    %30 = vector.shape_cast %29 : vector<8x16x32xf32> to vector<128x32xf32>
    %c2_i32 = arith.constant 2 : i32
    %31 = arith.addi %1, %c2_i32 : i32
    %32 = arith.index_cast %31 : i32 to index
    %c0_23 = arith.constant 0 : index
    %c0_24 = arith.constant 0 : index
    %33 = vector.load %arg6[%32, %c0_23, %c0_24] : memref<18x18x32xf32, #tpu.memory_space<vmem>>, vector<8x16x32xf32>
    %34 = vector.shape_cast %33 : vector<8x16x32xf32> to vector<128x32xf32>
    %c2_i32_25 = arith.constant 2 : i32
    %35 = arith.addi %1, %c2_i32_25 : i32
    %36 = arith.index_cast %35 : i32 to index
    %c1_26 = arith.constant 1 : index
    %c0_27 = arith.constant 0 : index
    %37 = vector.load %arg6[%36, %c1_26, %c0_27] : memref<18x18x32xf32, #tpu.memory_space<vmem>>, vector<8x16x32xf32>
    %38 = vector.shape_cast %37 : vector<8x16x32xf32> to vector<128x32xf32>
    %c2_i32_28 = arith.constant 2 : i32
    %39 = arith.addi %1, %c2_i32_28 : i32
    %40 = arith.index_cast %39 : i32 to index
    %c2_29 = arith.constant 2 : index
    %c0_30 = arith.constant 0 : index
    %41 = vector.load %arg6[%40, %c2_29, %c0_30] : memref<18x18x32xf32, #tpu.memory_space<vmem>>, vector<8x16x32xf32>
    %42 = vector.shape_cast %41 : vector<8x16x32xf32> to vector<128x32xf32>
    %43 = tpu.concatenate %10, %14, %18, %22, %26, %30, %34, %38, %42 in 1 : vector<128x32xf32>, vector<128x32xf32>, vector<128x32xf32>, vector<128x32xf32>, vector<128x32xf32>, vector<128x32xf32>, vector<128x32xf32>, vector<128x32xf32>, vector<128x32xf32> -> vector<128x288xf32>
    %c0_31 = arith.constant 0 : index
    %c0_32 = arith.constant 0 : index
    %44 = vector.load %arg3[%c0_31, %c0_32] : memref<48x288xf32, #tpu.memory_space<vmem>>, vector<48x288xf32>
    %cst_33 = arith.constant dense<0.000000e+00> : vector<48x128xf32>
    %45 = tpu.matmul %44, %43, %cst_33 {dimension_numbers = #tpu.dot_dimension_numbers<[1], [1], [0], [0], [0, 0, 1, 0], [], []>} : vector<48x288xf32>, vector<128x288xf32>, vector<48x128xf32> -> vector<48x128xf32>
    %c0_34 = arith.constant 0 : index
    %c0_35 = arith.constant 0 : index
    %46 = vector.load %arg4[%c0_34, %c0_35] : memref<48x1xf32, #tpu.memory_space<vmem>>, vector<48x1xf32>
    %47 = vector.broadcast %46 : vector<48x1xf32> to vector<48x128xf32>
    %48 = arith.addf %45, %47 : vector<48x128xf32>
    %c0_36 = arith.constant 0 : index
    %c0_37 = arith.constant 0 : index
    %c0_38 = arith.constant 0 : index
    %49 = vector.load %arg5[%c0_36, %c0_37, %c0_38] : memref<1x48x128xf32, #tpu.memory_space<vmem>>, vector<1x48x128xf32>
    %50 = vector.shape_cast %49 : vector<1x48x128xf32> to vector<48x128xf32>
    %51 = vector.shape_cast %48 : vector<48x128xf32> to vector<1x48x128xf32>
    tpu.vector_store %arg5[%c0_36, %c0_37, %c0_38], %51 {strides = array<i32>} : memref<1x48x128xf32, #tpu.memory_space<vmem>>, vector<1x48x128xf32>,
    return
  }
  func.func @transform_0(%arg0: i32, %arg1: i32) -> (i32, i32, i32, i32) {
    %c0_i32 = arith.constant 0 : i32
    %c0_i32_0 = arith.constant 0 : i32
    %c0_i32_1 = arith.constant 0 : i32
    %c0_i32_2 = arith.constant 0 : i32
    return %arg0, %c0_i32, %c0_i32_0, %c0_i32_1 : i32, i32, i32, i32
  }
  func.func @transform_1(%arg0: i32, %arg1: i32) -> (i32, i32) {
    %c0_i32 = arith.constant 0 : i32
    %c0_i32_0 = arith.constant 0 : i32
    %c0_i32_1 = arith.constant 0 : i32
    return %c0_i32, %c0_i32_0 : i32, i32
  }
  func.func @transform_2(%arg0: i32, %arg1: i32) -> (i32, i32) {
    %c0_i32 = arith.constant 0 : i32
    %c0_i32_0 = arith.constant 0 : i32
    %c0_i32_1 = arith.constant 0 : i32
    return %c0_i32, %c0_i32_0 : i32, i32
  }
  func.func @transform_3(%arg0: i32, %arg1: i32) -> (i32, i32, i32) {
    %c0_i32 = arith.constant 0 : i32
    %c0_i32_0 = arith.constant 0 : i32
    return %arg0, %c0_i32, %arg1 : i32, i32, i32
  }
}

</mosaic_0001>

<bundles_post_ra>
// kernel: pixel_shuffle_direct_forward.1
= control target key start
LH: loop header
LB: loop body
LE: loop exit
PB: predicated region body
PF: predicated region fallthrough
CT: control target
= control target key end

     0   :  { %8 = vsyncpa [#allocation4], 0  ;;  %s2933_s0 = inlined_call_operand.hbm [shape: f32[2,16,16,32], index: 0, kind: input, shape index: {}]   ;;  %s2934_s1 = inlined_call_operand.vmem [shape: f32[48,288], index: 1, kind: input, shape index: {}]   ;;  %s2935_s2 = inlined_call_operand.vmem [shape: f32[48,1], index: 2, kind: input, shape index: {}]   ;;  %s2936_s3 = inlined_call_operand.vmem [shape: f32[2,48,256], index: 3, kind: output, shape index: {}]  }
   0x1   :  { %10 = vsyncpa [#allocation4 + $0x1], 0  ;;  %s2179_s12 = smov 0   ;;  %s2181_s13 = smov 0  }
   0x2   :  { %s2183_s14 = smov 0   ;;  %s2185_s15 = smov 0  }
   0x3   :  { %s2187_s16 = smov 0   ;;  %s2189_s17 = smov 0  }
   0x4   :  { %s2191_s18 = smov 0   ;;  %s2193_s19 = smov 0  }
   0x5   :  { %s2195_s20 = smov 0   ;;  %s2197_s21 = smov 0  }
   0x6 LB: > { %s1419_s22 = sadd.s32 4294967295, %s2149_s21   ;;  %s25_s23 = sadd.s32 1, %s2141_s19  ;;  %s2149_s21 = sphi %s2197_s21, %s16_s21   ;;  %s2145_s20 = sphi %s2195_s20, %s2956_s20   ;;  %s2141_s19 = sphi %s2193_s19, %s2955_s19   ;;  %s2137_s18 = sphi %s2191_s18, %s2954_s18   ;;  %s2133_s17 = sphi %s2189_s17, %s2953_s17   ;;  %s2129_s16 = sphi %s2187_s16, %s2952_s16   ;;  %s2125_s15 = sphi %s2185_s15, %s2951_s15   ;;  %s2121_s14 = sphi %s2183_s14, %s2950_s14   ;;  %s2117_s13 = sphi %s2181_s13, %s2949_s13   ;;  %s2113_s12 = sphi %s2179_s12, %s2948_s12  }
   0x7   : > { %p26_p0 = scmp.ge.s32.totalorder %s25_s23, 2  ;;  %s28_s24 = sadd.s32 1, %s2145_s20 }
   0x8   : > { %s35_s25 = sadd.s32 1, %s2129_s16  ;;  %p42_p1 = scmp.ne.s32.totalorder %s2129_s16, %s2125_s15 }
   0x9   : > { %s2958_s23 = smov (%p26_p0, %s25_s23), 0  ;;  %s2960_s24 = smov (!%p26_p0, %s28_s24), %s2145_s20 }
   0xa   : > { %p43_p2 = scmp.eq.s32.totalorder %s2149_s21, 0  ;;  %p48_p3 = scmp.ne.s32.totalorder %s2125_s15, %s2121_s14 }
   0xb   : > { %p30_p4 = scmp.ge.s32.totalorder %s2960_s24, 2  ;;  %p49_p5 = scmp.eq.s32.totalorder %s1419_s22, 0 }
   0xc   : > { %p2238_p6 = por %p43_p2, %p42_p1  ;;  %s101_s27 = ssub.s32 %s2141_s19, %s2958_s23 }
   0xd   : > { %s2962_s24 = smov (%p30_p4, %s2960_s24), 0  ;;  %p2246_p7 = por %p49_p5, %p48_p3 }
   0xe   : > { %2939 = sst [smem:[#allocation7_spill]] %s2962_s24  ;;  %s105_s29 = sadd.s32 1, %s2117_s13 }
   0xf   : > { %s32_s30 = ssub.s32 %s2145_s20, %s2962_s24  ;;  %p115_p8 = scmp.ne.s32.totalorder %s2117_s13, %s2113_s12 }
  0x10   : > { %p33_p9 = scmp.eq.s32.totalorder %s32_s30, 0  ;;  %s102_s4 = sor.u32 %s101_s27, %s32_s30 }
  0x11   : > { %p103_p10 = scmp.eq.s32.totalorder %s102_s4, 0  ;;  %p116_p11 = scmp.eq.s32.totalorder %s1419_s22, 3 }
  0x12   : > { %s2256_s5 = scalar_select %p33_p9, %s2129_s16, %s35_s25  }
  0x13   : > { %s2259_s6 = scalar_select %p103_p10, %s2117_s13, %s105_s29  }
  0x14   : > { %p2261_p12 = por %p116_p11, %p115_p8  ;;  %p1707_p13 = scmp.lt.s32.totalorder %s2149_s21, 4 }
  0x15   : > { %s148_s8 = sand.u32 1, %s2129_s16   ;;  %s1555_s10 = sshll.u32 %s2145_s20, 12 }
  0x16   : > { %s2941_s7 = scalar_select %p2261_p12, 1, 0 }
  0x17   : > { %s1423_s9 = sshll.u32 %s148_s8, 8  ;;  %s2271_s24 = scalar_lea.hbm %s2933_s0, %s1555_s10 }
  0x18   : > { %s152_s22 = scalar_lea.vmem [#allocation3], %s1423_s9  ;;  %p2277_p0 = pnand %p1707_p13, %p2238_p6 }
  0x19   : > { %s159_s25 = sshll.u32 %s152_s22, 4  ;;  %s2282_s29 = scalar_lea.sflag [#allocation4], %s148_s8  ;;  %s2273_s25 = int_to_ptr.vmem [resolvable:$true] %s159_s25 }
  0x1a   : > { %s2037_s30 = scalar_lea.hbm %s2271_s24, 4096  ;;  %p2039_p3 = pneg %p2277_p0 }
  0x1b   : > { %p2038_p2 = scmp.ne.s32.totalorder %s2271_s24, %s2037_s30  ;;  %s2042_s26 = scalar_lea.hbm %s2933_s0, 8192 }
  0x1c   : > { %p2043_p6 = scmp.lt.u32.totalorder %s2271_s24, %s2933_s0  ;;  %p2044_p8 = scmp.lt.u32.totalorder %s2042_s26, %s2037_s30 }
  0x1d   : > { %p2040_p4 = pnand %p2039_p3, %p2038_p2  ;;  %p2046_p10 = scmp.lt.u32.totalorder %s2037_s30, %s2271_s24 }
  0x1e   : > { %p2045_p9 = por %p2044_p8, %p2043_p6 }
  0x1f   : > { %p2041_p5 = pneg %p2040_p4 }
  0x20   : > { %p2047_p11 = por %p2046_p10, %p2045_p9 }
  0x22   : > { %p2048_p13 = pnand %p2047_p11, %p2041_p5 }
  0x24   : > { %2051 = shalt.err (!%p2048_p13)
}
  0x25   : > { %s2052_s8 = scalar_lea.vmem %s2273_s25, 4096  ;;  %s2151_s14 = smov [#allocation3]  }
  0x26   : > { %p2053_p2 = scmp.ne.s32.totalorder %s2273_s25, %s2052_s8  ;;  %s2057_s22 = sshll.u32 %s2151_s14, 4  ;;  %s2058_s22 = int_to_ptr.vmem [resolvable:$false] %s2057_s22 }
  0x27   : > { %s2059_s4 = scalar_lea.vmem %s2058_s22, 8192  ;;  %p2060_p12 = scmp.lt.s32.totalorder %s2273_s25, %s2058_s22 }
  0x28   : > { %p2055_p4 = pnand %p2053_p2, %p2039_p3  ;;  %p2061_p6 = scmp.lt.s32.totalorder %s2059_s4, %s2052_s8 }
  0x2a   : > { %p2056_p1 = pneg %p2055_p4  ;;  %p2062_p8 = por %p2061_p6, %p2060_p12 }
  0x2c   : > { %p2063_p9 = pnand %p2062_p8, %p2056_p1 }
  0x2e   : > { %2066 = shalt.err (!%p2063_p9)
}
  0x2f   : > { %s2152_s30 = smov 128   ;;  %s2153_s9 = smov 8  }
  0x30   : > { %1706 = dma.hbm_to_vmem [thread:$0]  (!%p2277_p0), %s2271_s24, 4096, %s2273_s25, %s2282_s29, %s2152_s30, %s2152_s30, %s2153_s9  }
  0x31   : > { %p167_p3 = scmp.lt.s32.totalorder %s2149_s21, 5  ;;  %p2943_p5 = scmp.ge.s32.totalorder %s2149_s21, 1 }
  0x33   : > { %p168_p10 = pnand %p2943_p5, %p167_p3 }
  0x34   : > { %s173_s26 = sand.u32 (!%p168_p10), 1, %s2125_s15  }
  0x35   : > { %171 = sbr.rel (%p168_p10) target bundleno = 580 (0x244), region = 32  ;;  %s1427_s10 = sshll.u32 (!%p168_p10), %s173_s26, 8 }
  0x36   : > { %s174_s11 = scalar_lea.sflag (!%p168_p10), [#allocation4], %s173_s26  ;;  %s2314_s8 = scalar_lea.vmem (!%p168_p10), [#allocation3], %s1427_s10 }
  0x3c   : > { %2108 = dma.done.wait (%p2246_p7), %s174_s11, 4096  }
  0x3d   : > { %2110 = vsyncadd (%p2246_p7), %s174_s11, 4294963200  ;;  %vm200_vm0 = vcmask 261120   ;;  %vm203_vm1 = vcmask 254976   ;;  %v2154_v0 = vmov 0.0   ;;  %v256_v1 = vld [vmem:[%s2314_s8] sm:$0xff]  ;;  %v257_v2 = vld [vmem:[%s2314_s8 + $0x8] sm:$0xff] }
  0x3e   : > { %201 = vst.msk [vmem:[#allocation2] sm:$0xff] %vm200_vm0, %v2154_v0  ;;  %202 = vst.msk [vmem:[#allocation2 + $0x8] sm:$0xff] %vm200_vm0, %v2154_v0  ;;  %v258_v3 = vld [vmem:[%s2314_s8 + $0x10] sm:$0xff]  ;;  %v259_v4 = vld [vmem:[%s2314_s8 + $0x18] sm:$0xff]  ;;  %s1429_s24 = smul.u32 192, %s2133_s17  ;;  %s2155_s25 = smov 64  }
  0x3f   : > { %204 = vst.msk [vmem:[#allocation2 + $0x10] sm:$0x3] %vm203_vm1, %v2154_v0  ;;  %207 = vst.msk [vmem:[#allocation2 + $0x28] sm:$0x3] %vm203_vm1, %v2154_v0  ;;  %v260_v5 = vld [vmem:[%s2314_s8 + $0x20] sm:$0xff]  ;;  %v261_v6 = vld [vmem:[%s2314_s8 + $0x28] sm:$0xff] }
  0x40   : > { %205 = vst.msk [vmem:[#allocation2 + $0x18] sm:$0xff] %vm200_vm0, %v2154_v0  ;;  %206 = vst.msk [vmem:[#allocation2 + $0x20] sm:$0xff] %vm200_vm0, %v2154_v0  ;;  %v262_v7 = vld [vmem:[%s2314_s8 + $0x30] sm:$0xff]  ;;  %v263_v8 = vld [vmem:[%s2314_s8 + $0x38] sm:$0xff]  ;;  %s2439_s28 = scalar_lea.vmem [#allocation2], %s1429_s24  ;;  %s2156_s27 = smov 32  }
  0x41   : > { %208 = vst.msk [vmem:[#allocation2 + $0x30] sm:$0xff] %vm200_vm0, %v2154_v0  ;;  %209 = vst.msk [vmem:[#allocation2 + $0x38] sm:$0xff] %vm200_vm0, %v2154_v0  ;;  %v264_v9 = vld [vmem:[%s2314_s8 + $0x40] sm:$0xff]  ;;  %v265_v10 = vld [vmem:[%s2314_s8 + $0x48] sm:$0xff]  ;;  %s2157_s29 = smov 96   ;;  %vm873_vm3 = vcmask 523264  }
  0x42   : > { %210 = vst.msk [vmem:[#allocation2 + $0x40] sm:$0x3] %vm203_vm1, %v2154_v0  ;;  %213 = vst.msk [vmem:[#allocation2 + $0x58] sm:$0x3] %vm203_vm1, %v2154_v0  ;;  %v266_v11 = vld [vmem:[%s2314_s8 + $0x50] sm:$0xff]  ;;  %v267_v12 = vld [vmem:[%s2314_s8 + $0x58] sm:$0xff] }
  0x43   : > { %211 = vst.msk [vmem:[#allocation2 + $0x48] sm:$0xff] %vm200_vm0, %v2154_v0  ;;  %212 = vst.msk [vmem:[#allocation2 + $0x50] sm:$0xff] %vm200_vm0, %v2154_v0  ;;  %v268_v13 = vld [vmem:[%s2314_s8 + $0x60] sm:$0xff]  ;;  %v269_v14 = vld [vmem:[%s2314_s8 + $0x68] sm:$0xff]  ;;  %vm890_vm4 = vcmask 785408   ;;  %s196_s11 = sand.u32 1, %s2113_s12  }
  0x44   : > { %214 = vst.msk [vmem:[#allocation2 + $0x60] sm:$0xff] %vm200_vm0, %v2154_v0  ;;  %215 = vst.msk [vmem:[#allocation2 + $0x68] sm:$0xff] %vm200_vm0, %v2154_v0  ;;  %v270_v15 = vld [vmem:[%s2314_s8 + $0x70] sm:$0xff]  ;;  %v271_v16 = vld [vmem:[%s2314_s8 + $0x78] sm:$0xff]  ;;  %p2946_p7 = scmp.ne.s32.totalorder %s2941_s7, 0 }
  0x45   : > { %216 = vst.msk [vmem:[#allocation2 + $0x70] sm:$0x3] %vm203_vm1, %v2154_v0  ;;  %219 = vst.msk [vmem:[#allocation2 + $0x88] sm:$0x3] %vm203_vm1, %v2154_v0  ;;  %v272_v17 = vld [vmem:[%s2314_s8 + $0x80] sm:$0xff]  ;;  %v273_v18 = vld [vmem:[%s2314_s8 + $0x88] sm:$0xff] }
  0x46   : > { %217 = vst.msk [vmem:[#allocation2 + $0x78] sm:$0xff] %vm200_vm0, %v2154_v0  ;;  %218 = vst.msk [vmem:[#allocation2 + $0x80] sm:$0xff] %vm200_vm0, %v2154_v0  ;;  %v274_v19 = vld [vmem:[%s2314_s8 + $0x90] sm:$0xff]  ;;  %v275_v20 = vld [vmem:[%s2314_s8 + $0x98] sm:$0xff]  ;;  %s1700_s12 = smul.u32 (%p2946_p7), 12, %s2137_s18 }
  0x47   : > { %220 = vst.msk [vmem:[#allocation2 + $0x90] sm:$0xff] %vm200_vm0, %v2154_v0  ;;  %221 = vst.msk [vmem:[#allocation2 + $0x98] sm:$0xff] %vm200_vm0, %v2154_v0  ;;  %v276_v21 = vld [vmem:[%s2314_s8 + $0xa0] sm:$0xff]  ;;  %v277_v22 = vld [vmem:[%s2314_s8 + $0xa8] sm:$0xff] }
  0x48   : > { %222 = vst.msk [vmem:[#allocation2 + $0xa0] sm:$0x3] %vm203_vm1, %v2154_v0  ;;  %225 = vst.msk [vmem:[#allocation2 + $0xb8] sm:$0x3] %vm203_vm1, %v2154_v0  ;;  %v278_v23 = vld [vmem:[%s2314_s8 + $0xb0] sm:$0xff]  ;;  %v279_v24 = vld [vmem:[%s2314_s8 + $0xb8] sm:$0xff] }
  0x49   : > { %223 = vst.msk [vmem:[#allocation2 + $0xa8] sm:$0xff] %vm200_vm0, %v2154_v0  ;;  %224 = vst.msk [vmem:[#allocation2 + $0xb0] sm:$0xff] %vm200_vm0, %v2154_v0  ;;  %v280_v25 = vld [vmem:[%s2314_s8 + $0xc0] sm:$0xff]  ;;  %v281_v26 = vld [vmem:[%s2314_s8 + $0xc8] sm:$0xff] }
  0x4a   : > { %226 = vst.msk [vmem:[#allocation2 + $0xc0] sm:$0xff] %vm200_vm0, %v2154_v0  ;;  %227 = vst.msk [vmem:[#allocation2 + $0xc8] sm:$0xff] %vm200_vm0, %v2154_v0  ;;  %v282_v27 = vld [vmem:[%s2314_s8 + $0xd0] sm:$0xff]  ;;  %v283_v28 = vld [vmem:[%s2314_s8 + $0xd8] sm:$0xff] }
  0x4b   : > { %228 = vst.msk [vmem:[#allocation2 + $0xd0] sm:$0x3] %vm203_vm1, %v2154_v0  ;;  %231 = vst.msk [vmem:[#allocation2 + $0xe8] sm:$0x3] %vm203_vm1, %v2154_v0  ;;  %v284_v29 = vld [vmem:[%s2314_s8 + $0xe0] sm:$0xff]  ;;  %v285_v30 = vld [vmem:[%s2314_s8 + $0xe8] sm:$0xff] }
  0x4c   : > { %229 = vst.msk [vmem:[#allocation2 + $0xd8] sm:$0xff] %vm200_vm0, %v2154_v0  ;;  %230 = vst.msk [vmem:[#allocation2 + $0xe0] sm:$0xff] %vm200_vm0, %v2154_v0  ;;  %v286_v31 = vld [vmem:[%s2314_s8 + $0xf0] sm:$0xff]  ;;  %v287_v32 = vld [vmem:[%s2314_s8 + $0xf8] sm:$0xff]  ;;  %s1699_s8 = smul.u32 48, %s196_s11 }
  0x4d   : > { %232 = vst.msk [vmem:[#allocation2 + $0xf0] sm:$0xff] %vm200_vm0, %v2154_v0  ;;  %233 = vst.msk [vmem:[#allocation2 + $0xf8] sm:$0xff] %vm200_vm0, %v2154_v0 }
  0x4e   : > { %234 = vst.msk [vmem:[#allocation2 + $0x100] sm:$0x3] %vm203_vm1, %v2154_v0  ;;  %237 = vst.msk [vmem:[#allocation2 + $0x118] sm:$0x3] %vm203_vm1, %v2154_v0  ;;  %s2882_s24 = scalar_lea.vmem [#allocation5], %s1699_s8 }
  0x4f   : > { %235 = vst.msk [vmem:[#allocation2 + $0x108] sm:$0xff] %vm200_vm0, %v2154_v0  ;;  %236 = vst.msk [vmem:[#allocation2 + $0x110] sm:$0xff] %vm200_vm0, %v2154_v0 }
  0x50   : > { %238 = vst.msk [vmem:[#allocation2 + $0x120] sm:$0xff] %vm200_vm0, %v2154_v0  ;;  %239 = vst.msk [vmem:[#allocation2 + $0x128] sm:$0xff] %vm200_vm0, %v2154_v0 }
  0x51   : > { %240 = vst.msk [vmem:[#allocation2 + $0x130] sm:$0x3] %vm203_vm1, %v2154_v0  ;;  %243 = vst.msk [vmem:[#allocation2 + $0x148] sm:$0x3] %vm203_vm1, %v2154_v0 }
  0x52   : > { %241 = vst.msk [vmem:[#allocation2 + $0x138] sm:$0xff] %vm200_vm0, %v2154_v0  ;;  %242 = vst.msk [vmem:[#allocation2 + $0x140] sm:$0xff] %vm200_vm0, %v2154_v0 }
  0x53   : > { %244 = vst.msk [vmem:[#allocation2 + $0x150] sm:$0xff] %vm200_vm0, %v2154_v0  ;;  %245 = vst.msk [vmem:[#allocation2 + $0x158] sm:$0xff] %vm200_vm0, %v2154_v0 }
  0x54   : > { %246 = vst.msk [vmem:[#allocation2 + $0x160] sm:$0x3] %vm203_vm1, %v2154_v0  ;;  %249 = vst.msk [vmem:[#allocation2 + $0x178] sm:$0x3] %vm203_vm1, %v2154_v0 }
  0x55   : > { %247 = vst.msk [vmem:[#allocation2 + $0x168] sm:$0xff] %vm200_vm0, %v2154_v0  ;;  %248 = vst.msk [vmem:[#allocation2 + $0x170] sm:$0xff] %vm200_vm0, %v2154_v0 }
  0x56   : > { %250 = vst.msk [vmem:[#allocation2 + $0x180] sm:$0xff] %vm200_vm0, %v2154_v0  ;;  %251 = vst.msk [vmem:[#allocation2 + $0x188] sm:$0xff] %vm200_vm0, %v2154_v0 }
  0x57   : > { %252 = vst.msk [vmem:[#allocation2 + $0x190] sm:$0x3] %vm203_vm1, %v2154_v0  ;;  %255 = vst.msk [vmem:[#allocation2 + $0x1a8] sm:$0x3] %vm203_vm1, %v2154_v0 }
  0x58   : > { %253 = vst.msk [vmem:[#allocation2 + $0x198] sm:$0xff] %vm200_vm0, %v2154_v0  ;;  %254 = vst.msk [vmem:[#allocation2 + $0x1a0] sm:$0xff] %vm200_vm0, %v2154_v0 }
  0x59   : > { %289 = vst.msk [vmem:[#allocation2 + $0x19] sm:$0xff] %vm200_vm0, %v256_v1  ;;  %290 = vst.msk [vmem:[#allocation2 + $0x21] sm:$0xff] %vm200_vm0, %v257_v2 }
  0x5a   : > { %291 = vst.msk [vmem:[#allocation2 + $0x31] sm:$0xff] %vm200_vm0, %v258_v3  ;;  %292 = vst.msk [vmem:[#allocation2 + $0x39] sm:$0xff] %vm200_vm0, %v259_v4 }
  0x5b   : > { %293 = vst.msk [vmem:[#allocation2 + $0x49] sm:$0xff] %vm200_vm0, %v260_v5  ;;  %294 = vst.msk [vmem:[#allocation2 + $0x51] sm:$0xff] %vm200_vm0, %v261_v6 }
  0x5c   : > { %295 = vst.msk [vmem:[#allocation2 + $0x61] sm:$0xff] %vm200_vm0, %v262_v7  ;;  %296 = vst.msk [vmem:[#allocation2 + $0x69] sm:$0xff] %vm200_vm0, %v263_v8 }
  0x5d   : > { %297 = vst.msk [vmem:[#allocation2 + $0x79] sm:$0xff] %vm200_vm0, %v264_v9  ;;  %298 = vst.msk [vmem:[#allocation2 + $0x81] sm:$0xff] %vm200_vm0, %v265_v10  ;;  %v960_v9 = vld [vmem:[%s2934_s1 + $0x28] sm:$0xff] }
  0x5e   : > { %299 = vst.msk [vmem:[#allocation2 + $0x91] sm:$0xff] %vm200_vm0, %v266_v11  ;;  %300 = vst.msk [vmem:[#allocation2 + $0x99] sm:$0xff] %vm200_vm0, %v267_v12 }
  0x5f   : > { %301 = vst.msk [vmem:[#allocation2 + $0xa9] sm:$0xff] %vm200_vm0, %v268_v13  ;;  %302 = vst.msk [vmem:[#allocation2 + $0xb1] sm:$0xff] %vm200_vm0, %v269_v14 }
  0x60   : > { %303 = vst.msk [vmem:[#allocation2 + $0xc1] sm:$0xff] %vm200_vm0, %v270_v15  ;;  %304 = vst.msk [vmem:[#allocation2 + $0xc9] sm:$0xff] %vm200_vm0, %v271_v16 }
  0x61   : > { %305 = vst.msk [vmem:[#allocation2 + $0xd9] sm:$0xff] %vm200_vm0, %v272_v17  ;;  %306 = vst.msk [vmem:[#allocation2 + $0xe1] sm:$0xff] %vm200_vm0, %v273_v18 }
  0x62   : > { %307 = vst.msk [vmem:[#allocation2 + $0xf1] sm:$0xff] %vm200_vm0, %v274_v19  ;;  %308 = vst.msk [vmem:[#allocation2 + $0xf9] sm:$0xff] %vm200_vm0, %v275_v20 }
  0x63   : > { %309 = vst.msk [vmem:[#allocation2 + $0x109] sm:$0xff] %vm200_vm0, %v276_v21  ;;  %310 = vst.msk [vmem:[#allocation2 + $0x111] sm:$0xff] %vm200_vm0, %v277_v22 }
  0x64   : > { %311 = vst.msk [vmem:[#allocation2 + $0x121] sm:$0xff] %vm200_vm0, %v278_v23  ;;  %312 = vst.msk [vmem:[#allocation2 + $0x129] sm:$0xff] %vm200_vm0, %v279_v24 }
  0x65   : > { %313 = vst.msk [vmem:[#allocation2 + $0x139] sm:$0xff] %vm200_vm0, %v280_v25  ;;  %314 = vst.msk [vmem:[#allocation2 + $0x141] sm:$0xff] %vm200_vm0, %v281_v26 }
  0x66   : > { %315 = vst.msk [vmem:[#allocation2 + $0x151] sm:$0xff] %vm200_vm0, %v282_v27  ;;  %316 = vst.msk [vmem:[#allocation2 + $0x159] sm:$0xff] %vm200_vm0, %v283_v28 }
  0x67   : > { %317 = vst.msk [vmem:[#allocation2 + $0x169] sm:$0xff] %vm200_vm0, %v284_v29  ;;  %318 = vst.msk [vmem:[#allocation2 + $0x171] sm:$0xff] %vm200_vm0, %v285_v30 }
  0x68   : > { %319 = vst.msk [vmem:[#allocation2 + $0x181] sm:$0xff] %vm200_vm0, %v286_v31  ;;  %320 = vst.msk [vmem:[#allocation2 + $0x189] sm:$0xff] %vm200_vm0, %v287_v32 }
  0x69   : > { %vm2533_vm2 = vmpackc.low %vm200_vm0, %vm200_vm0 }
  0x6f   : > { %v2442_v33 = vld [vmem:[%s2439_s28 + $0x30] sm:$0xff]  ;;  %v2445_v34 = vld [vmem:[%s2439_s28 + $0x38] sm:$0xff]  ;;  %v1465_v37 = vld [vmem:[%s2439_s28 + $0x22] sm:$0xff] }
  0x70   : > { %v1464_v35 = vld [vmem:[%s2439_s28 + $0x1a] sm:$0xff]  ;;  %v1805_v36 = vpack.i.bf16 %v2445_v34, %v2442_v33  ;;  %v355_v38 = vld [vmem:[%s2439_s28 + $0x2] sm:$0xff]  ;;  %v356_v39 = vld [vmem:[%s2439_s28 + $0xa] sm:$0xff] }
  0x71   : > { %v1795_v40 = vpack.i.bf16 %v1465_v37, %v1464_v35  ;;  %v339_v41 = vld [vmem:[%s2439_s28 + $0x1] sm:$0xff]  ;;  %v340_v42 = vld [vmem:[%s2439_s28 + $0x9] sm:$0xff]  ;;  %v1810_v43 = vpack.i.bf16 %v356_v39, %v355_v38  ;;  %v2458_v45 = vld [vmem:[%s2439_s28 + $0x18] sm:$0xff] }
  0x72   : > { %1806 = vrot.lane.b32.xlu1 %v1805_v36, %s2155_s25  ;;  %v1800_v44 = vpack.i.bf16 %v340_v42, %v339_v41  ;;  %v2461_v46 = vld [vmem:[%s2439_s28 + $0x20] sm:$0xff]  ;;  %v2464_v47 = vld [vmem:[%s2439_s28 + $0x31] sm:$0xff]  ;;  %v2488_v57 = vld [vmem:[%s2439_s28 + $0x48] sm:$0xff] }
  0x73   : > { %1796 = vrot.lane.b32.xlu0 %v1795_v40, %s2156_s27  ;;  %v2467_v48 = vld [vmem:[%s2439_s28 + $0x39] sm:$0xff]  ;;  %v1820_v49 = vpack.i.bf16 %v2461_v46, %v2458_v45  ;;  %v2479_v52 = vld [vmem:[%s2439_s28 + $0x21] sm:$0xff]  ;;  %v2491_v58 = vld [vmem:[%s2439_s28 + $0x50] sm:$0xff] }
  0x74   : > { %v1815_v50 = vpack.i.bf16 %v2467_v48, %v2464_v47  ;;  %v2476_v51 = vld [vmem:[%s2439_s28 + $0x19] sm:$0xff]  ;;  %v1835_v59 = vpack.i.bf16 %v2491_v58, %v2488_v57  ;;  %v2498_v60 = vld [vmem:[%s2439_s28 + $0x49] sm:$0xff]  ;;  %v2501_v61 = vld [vmem:[%s2439_s28 + $0x51] sm:$0xff] }
  0x75   : > { %v1466_v53 = vld [vmem:[%s2439_s28 + $0x32] sm:$0xff]  ;;  %v1467_v54 = vld [vmem:[%s2439_s28 + $0x3a] sm:$0xff]  ;;  %v1830_v55 = vpack.i.bf16 %v2479_v52, %v2476_v51  ;;  %v1845_v62 = vpack.i.bf16 %v2501_v61, %v2498_v60  ;;  %v1468_v63 = vld [vmem:[%s2439_s28 + $0x4a] sm:$0xff] }
  0x76   : > { %1811 = vrot.lane.b32.xlu1 %v1810_v43, %s2155_s25  ;;  %v1825_v56 = vpack.i.bf16 %v1467_v54, %v1466_v53  ;;  %v1469_v0 = vld [vmem:[%s2439_s28 + $0x52] sm:$0xff]  ;;  %v2512_v2 = vld [vmem:[%s2439_s28 + $0x60] sm:$0xff]  ;;  %v2515_v3 = vld [vmem:[%s2439_s28 + $0x68] sm:$0xff]  ;;  %v1651_v7 = vpack.c.bf16 %v1467_v54, %v1466_v53 }
  0x77   : > { %1801 = vrot.lane.b32.xlu0 %v1800_v44, %s2156_s27  ;;  %v1855_v1 = vpack.i.bf16 %v1469_v0, %v1468_v63  ;;  %v1865_v4 = vpack.i.bf16 %v2515_v3, %v2512_v2  ;;  %v2522_v5 = vld [vmem:[%s2439_s28 + $0x61] sm:$0xff]  ;;  %v2525_v6 = vld [vmem:[%s2439_s28 + $0x69] sm:$0xff]  ;;  %v2546_v13 = vld [vmem:[%s2439_s28 + $0x78] sm:$0xff]  ;;  %v1657_v15 = vpack.c.bf16 %v1469_v0, %v1468_v63 }
  0x78   : > { %v1875_v8 = vpack.i.bf16 %v2525_v6, %v2522_v5  ;;  %v1470_v10 = vld [vmem:[%s2439_s28 + $0x62] sm:$0xff]  ;;  %v1471_v11 = vld [vmem:[%s2439_s28 + $0x6a] sm:$0xff]  ;;  %1653 = vmatprep.subr.msk.bf16.mxu1 %vm2533_vm2, %v1651_v7  ;;  %v2556_v17 = vld [vmem:[%s2439_s28 + $0x79] sm:$0xff] }
  0x79   : > { %1656 = vmatpush3.bf16.xpose.msk.msra.mxu1 %vm2533_vm2, %v1651_v7  ;;  %v1885_v12 = vpack.i.bf16 %v1471_v11, %v1470_v10  ;;  %v2549_v14 = vld [vmem:[%s2439_s28 + $0x80] sm:$0xff]  ;;  %v1663_v22 = vpack.c.bf16 %v1471_v11, %v1470_v10  ;;  %v2574_v24 = vld [vmem:[%s2439_s28 + $0x90] sm:$0xff]  ;;  %v2577_v25 = vld [vmem:[%s2439_s28 + $0x98] sm:$0xff] }
  0x7a   : > { %1821 = vrot.lane.b32.xlu1 %v1820_v49, %s2157_s29  ;;  %v1895_v16 = vpack.i.bf16 %v2549_v14, %v2546_v13  ;;  %v2559_v18 = vld [vmem:[%s2439_s28 + $0x81] sm:$0xff]  ;;  %1659 = vmatprep.subr.msk.bf16.mxu1 %vm2533_vm2, %v1657_v15  ;;  %v1925_v26 = vpack.i.bf16 %v2577_v25, %v2574_v24  ;;  %v2588_v27 = vld [vmem:[%s2439_s28 + $0x91] sm:$0xff]  ;;  %v2591_v28 = vld [vmem:[%s2439_s28 + $0x99] sm:$0xff] }
  0x7b   : > { %1816 = vrot.lane.b32.xlu0 %v1815_v50, %s2157_s29  ;;  %v1905_v19 = vpack.i.bf16 %v2559_v18, %v2556_v17  ;;  %v1472_v20 = vld [vmem:[%s2439_s28 + $0x7a] sm:$0xff]  ;;  %v1473_v21 = vld [vmem:[%s2439_s28 + $0x82] sm:$0xff]  ;;  %v1935_v30 = vpack.i.bf16 %v2591_v28, %v2588_v27  ;;  %v1474_v31 = vld [vmem:[%s2439_s28 + $0x92] sm:$0xff] }
  0x7c   : > { %v1915_v23 = vpack.i.bf16 %v1473_v21, %v1472_v20  ;;  %v1669_v29 = vpack.c.bf16 %v1473_v21, %v1472_v20  ;;  %v1475_v32 = vld [vmem:[%s2439_s28 + $0x9a] sm:$0xff]  ;;  %v2609_v37 = vld [vmem:[%s2439_s28 + $0xb0] sm:$0xff]  ;;  %v1495_v54 = vld [vmem:[%s2439_s28 + $0xc8] sm:$0xff] }
  0x7d   : > { %v1945_v35 = vpack.i.bf16 %v1475_v32, %v1474_v31  ;;  %v1675_v38 = vpack.c.bf16 %v1475_v32, %v1474_v31  ;;  %v2619_v41 = vld [vmem:[%s2439_s28 + $0xb1] sm:$0xff]  ;;  %v1494_v53 = vld [vmem:[%s2439_s28 + $0xc0] sm:$0xff]  ;;  %v956_v20 = vld [vmem:[%s2934_s1 + $0x8] sm:$0xff] }
  0x7e   : > { %1831 = vrot.lane.b32.xlu1 %v1830_v55, %s2156_s27  ;;  %v1476_v43 = vld [vmem:[%s2439_s28 + $0xaa] sm:$0xff]  ;;  %v1477_v44 = vld [vmem:[%s2439_s28 + $0xb2] sm:$0xff]  ;;  %v1985_v55 = vpack.i.bf16 %v1495_v54, %v1494_v53  ;;  %v1528_v10 = vld [vmem:[%s2439_s28 + $0xda] sm:$0xff]  ;;  %1139 = vmatprep.mubr.f32.mxu0 %v956_v20 }
  0x7f   : > { %1826 = vrot.lane.b32.xlu0 %v1825_v56, %s2156_s27  ;;  %v1681_v49 = vpack.c.bf16 %v1477_v44, %v1476_v43  ;;  %v1479_v63 = vld [vmem:[%s2439_s28 + $0xca] sm:$0xff]  ;;  %v1496_v7 = vld [vmem:[%s2439_s28 + $0xd8] sm:$0xff]  ;;  %v1529_v11 = vld [vmem:[%s2439_s28 + $0xe2] sm:$0xff] }
  0x80   : > { %v973_v31 = vld [vmem:[%s2935_s2] sm:$0xff]  ;;  %v974_v32 = vld [vmem:[%s2935_s2 + $0x8] sm:$0xff] }
  0x81   : > { %1662 = vmatpush3.bf16.xpose.msk.msra.mxu1 %vm2533_vm2, %v1657_v15  ;;  %v323_v54 = vld [vmem:[%s2439_s28] sm:$0xff] }
  0x82   : > { %1841 = vrot.lane.b32.xlu1 %v1795_v40, %s2155_s25  ;;  %1665 = vmatprep.subr.msk.bf16.mxu1 %vm2533_vm2, %v1663_v22  ;;  %v2616_v40 = vld [vmem:[%s2439_s28 + $0xa9] sm:$0xff] }
  0x83   : > { %1836 = vrot.lane.b32.xlu0 %v1835_v59, %s2155_s25  ;;  %v1965_v42 = vpack.i.bf16 %v2619_v41, %v2616_v40 }
  0x86   : > { %1851 = vrot.lane.b32.xlu1 %v1805_v36, %s2157_s29  ;;  %v2606_v36 = vld [vmem:[%s2439_s28 + $0xa8] sm:$0xff] }
  0x87   : > { %1846 = vrot.lane.b32.xlu0 %v1845_v62, %s2157_s29  ;;  %v1955_v39 = vpack.i.bf16 %v2609_v37, %v2606_v36 }
  0x89   : > { %1668 = vmatpush3.bf16.xpose.msk.msra.mxu1 %vm2533_vm2, %v1663_v22  ;;  %v957_v22 = vld [vmem:[%s2934_s1 + $0x10] sm:$0xff] }
  0x8a   : > { %1861 = vrot.lane.b32.xlu1 %v1815_v50, %s2156_s27  ;;  %1671 = vmatprep.subr.msk.bf16.mxu1 %vm2533_vm2, %v1669_v29  ;;  %v1975_v50 = vpack.i.bf16 %v1477_v44, %v1476_v43  ;;  %v976_v43 = vld [vmem:[%s2935_s2 + $0x18] sm:$0xff] }
  0x8b   : > { %1856 = vrot.lane.b32.xlu0 %v1855_v1, %s2156_s27  ;;  %1610 = vmatprep.mubr.msk.f32.mxu1 %vm200_vm0, %v957_v22 }
  0x8e   : > { %1871 = vrot.lane.b32.xlu1 %v1825_v56, %s2155_s25  ;;  %v2642_v56 = vld [vmem:[%s2439_s28 + $0xc1] sm:$0xff] }
  0x8f   : > { %1866 = vrot.lane.b32.xlu0 %v1865_v4, %s2155_s25 }
  0x91   : > { %1674 = vmatpush3.bf16.xpose.msk.msra.mxu1 %vm2533_vm2, %v1669_v29  ;;  %v969_v29 = vld [vmem:[%s2934_s1 + $0x70] sm:$0xff] }
  0x92   : > { %1881 = vrot.lane.b32.xlu1 %v1835_v59, %s2157_s29  ;;  %1677 = vmatprep.subr.msk.bf16.mxu1 %vm2533_vm2, %v1675_v38  ;;  %v2645_v59 = vld [vmem:[%s2439_s28 + $0xc9] sm:$0xff] }
  0x93   : > { %1876 = vrot.lane.b32.xlu0 %v1875_v8, %s2157_s29 }
  0x96   : > { %1891 = vrot.lane.b32.xlu1 %v1845_v62, %s2156_s27  ;;  %v1478_v62 = vld [vmem:[%s2439_s28 + $0xc2] sm:$0xff] }
  0x97   : > { %1886 = vrot.lane.b32.xlu0 %v1885_v12, %s2156_s27  ;;  %v1687_v0 = vpack.c.bf16 %v1479_v63, %v1478_v62 }
  0x99   : > { %1680 = vmatpush3.bf16.xpose.msk.msra.mxu1 %vm2533_vm2, %v1675_v38  ;;  %v2158_v38 = vmov 0  }
  0x9a   : > { %1901 = vrot.lane.b32.xlu1 %v1855_v1, %s2155_s25  ;;  %1683 = vmatprep.subr.msk.bf16.mxu1 %vm2533_vm2, %v1681_v49  ;;  %v1995_v1 = vpack.i.bf16 %v2645_v59, %v2642_v56 }
  0x9b   : > { %1896 = vrot.lane.b32.xlu0 %v1895_v16, %s2155_s25  ;;  %2036 = vset.pattern.permute.xlu1 %v2158_v38 }
  0x9c   : > { %2035 = vset.pattern.permute.xlu0 %v2158_v38 }
  0x9e   : > { %1911 = vrot.lane.b32.xlu1 %v1865_v4, %s2157_s29  ;;  %v2005_v4 = vpack.i.bf16 %v1479_v63, %v1478_v62 }
  0x9f   : > { %1906 = vrot.lane.b32.xlu0 %v1905_v19, %s2157_s29 }
  0xa1   : > { %1686 = vmatpush3.bf16.xpose.msk.msra.mxu1 %vm2533_vm2, %v1681_v49 }
  0xa2   : > { %1921 = vrot.lane.b32.xlu1 %v1875_v8, %s2156_s27  ;;  %1689 = vmatprep.subr.msk.bf16.mxu1 %vm2533_vm2, %v1687_v0  ;;  %v1497_v8 = vld [vmem:[%s2439_s28 + $0xe0] sm:$0xff] }
  0xa3   : > { %1916 = vrot.lane.b32.xlu0 %v1915_v23, %s2156_s27  ;;  %v2015_v15 = vpack.i.bf16 %v1497_v8, %v1496_v7  ;;  %v978_v7 = vld [vmem:[%s2935_s2 + $0x28] sm:$0xff] }
  0xa6   : > { %1931 = vrot.lane.b32.xlu1 %v1885_v12, %s2155_s25  ;;  %v1693_v12 = vpack.c.bf16 %v1529_v11, %v1528_v10 }
  0xa7   : > { %1926 = vrot.lane.b32.xlu0 %v1925_v26, %s2155_s25 }
  0xa9   : > { %1692 = vmatpush3.bf16.xpose.msk.msra.mxu1 %vm2533_vm2, %v1687_v0 }
  0xaa   : > { %1941 = vrot.lane.b32.xlu1 %v1895_v16, %s2157_s29  ;;  %v1512_v16 = vld [vmem:[%s2439_s28 + $0xd9] sm:$0xff]  ;;  %1695 = vmatprep.subr.msk.bf16.mxu1 %vm2533_vm2, %v1693_v12 }
  0xab   : > { %1936 = vrot.lane.b32.xlu0 %v1935_v30, %s2157_s29 }
  0xae   : > { %1951 = vrot.lane.b32.xlu1 %v1905_v19, %s2156_s27  ;;  %v1513_v19 = vld [vmem:[%s2439_s28 + $0xe1] sm:$0xff] }
  0xaf   : > { %1946 = vrot.lane.b32.xlu0 %v1945_v35, %s2156_s27  ;;  %v2025_v21 = vpack.i.bf16 %v1513_v19, %v1512_v16 }
  0xb1   : > { %1698 = vmatpush3.bf16.xpose.msk.msra.mxu1 %vm2533_vm2, %v1693_v12 }
  0xb2   : > { %1961 = vrot.lane.b32.xlu1 %v1915_v23, %s2155_s25  ;;  %v963_v23 = vld [vmem:[%s2934_s1 + $0x40] sm:$0xff] }
  0xb3   : > { %1956 = vrot.lane.b32.xlu0 %v1955_v39, %s2155_s25 }
  0xb6   : > { %1971 = vrot.lane.b32.xlu1 %v1925_v26, %s2157_s29  ;;  %v966_v26 = vld [vmem:[%s2934_s1 + $0x58] sm:$0xff] }
  0xb7   : > { %1966 = vrot.lane.b32.xlu0 %v1965_v42, %s2157_s29 }
  0xb8   : > { %1611 = vmatmul.mubr.msk.f32.vlgmr.msra.gmra.mrb[0].mxu1 %vm200_vm0, %v960_v9 }
  0xb9   : > { %1613 = vmatprep.mubr.msk.f32.mxu1 %vm200_vm0, %v963_v23 }
  0xba   : > { %1981 = vrot.lane.b32.xlu1 %v1935_v30, %s2156_s27  ;;  %v972_v30 = vld [vmem:[%s2934_s1 + $0x88] sm:$0xff] }
  0xbb   : > { %1976 = vrot.lane.b32.xlu0 %v1975_v50, %s2156_s27 }
  0xbc   : > { %1614 = vmatmul.mubr.msk.f32.gmra.mrb[2].mxu1 %vm200_vm0, %v966_v26 }
  0xbd   : > { %1616 = vmatprep.mubr.msk.f32.mxu1 %vm200_vm0, %v969_v29 }
  0xbe   : > { %1991 = vrot.lane.b32.xlu1 %v1945_v35, %s2155_s25 }
  0xbf   : > { %1986 = vrot.lane.b32.xlu0 %v1985_v55, %s2155_s25 }
  0xc0   : > { %1617 = vmatmul.mubr.msk.f32.gmra.mrb[4].mxu1 %vm200_vm0, %v972_v30 }
  0xc2   : > { %2001 = vrot.lane.b32.xlu1 %v1955_v39, %s2157_s29 }
  0xc3   : > { %1996 = vrot.lane.b32.xlu0 %v1995_v1, %s2157_s29 }
  0xc6   : > { %2011 = vrot.lane.b32.xlu1 %v1965_v42, %s2156_s27  ;;  %v975_v42 = vld [vmem:[%s2935_s2 + $0x10] sm:$0xff] }
  0xc7   : > { %2006 = vrot.lane.b32.xlu0 %v2005_v4, %s2156_s27  ;;  %v977_v4 = vld [vmem:[%s2935_s2 + $0x20] sm:$0xff] }
  0xca   : > { %2021 = vrot.lane.b32.xlu1 %v1975_v50, %s2155_s25 }
  0xcb   : > { %2016 = vrot.lane.b32.xlu0 %v2015_v15, %s2155_s25  ;;  %s1279_s25 = sadd.s32 (%p2946_p7), %s2133_s17, %s1700_s12 }
  0xcc   : > { %s1552_s27 = sshll.u32 (%p2946_p7), %s1279_s25, 3 }
  0xce   : > { %2031 = vrot.lane.b32.xlu1 %v1985_v55, %s2157_s29  ;;  %v324_v55 = vld [vmem:[%s2439_s28 + $0x8] sm:$0xff]  ;;  %s1281_s28 = scalar_lea.vmem (%p2946_p7), %s2936_s3, %s1552_s27 }
  0xcf   : > { %2026 = vrot.lane.b32.xlu0 %v2025_v21, %s2157_s29 }
  0xd2   : > { %986 = vperm.xlu1 %2036, %v974_v32  }
  0xd3   : > { %981 = vperm.xlu0 %2035, %v973_v31  }
  0xd6   : > { %991 = vperm.xlu1 %2036, %v975_v42  }
  0xd7   : > { %996 = vperm.xlu0 %2035, %v976_v43  }
  0xda   : > { %1001 = vperm.xlu1 %2036, %v977_v4  }
  0xdb   : > { %1006 = vperm.xlu0 %2035, %v978_v7  }
  0xe4   : > { %v1807_v35 = vpop.permute.xlu1 %1806 }
  0xe5   : > { %v1797_v39 = vpop.permute.xlu0 %1796  ;;  %v1809_v8 = vunpack.i.h.bf16 %v1807_v35  ;;  %v1808_v10 = vunpack.i.l.bf16 %v1807_v35 }
  0xe6   : > { %v1799_v44 = vunpack.i.h.bf16 %v1797_v39  ;;  %v1798_v49 = vunpack.i.l.bf16 %v1797_v39 }
  0xe8   : > { %v1812_v50 = vpop.permute.xlu1 %1811  ;;  %v907_v16 = vsel %vm200_vm0, %v2476_v51, %v1798_v49  ;;  %v908_v19 = vsel %vm200_vm0, %v2479_v52, %v1799_v44 }
  0xe9   : > { %v1802_v53 = vpop.permute.xlu0 %1801  ;;  %v1814_v62 = vunpack.i.h.bf16 %v1812_v50  ;;  %v1813_v63 = vunpack.i.l.bf16 %v1812_v50  ;;  %v923_v30 = vsel %vm873_vm3, %v907_v16, %v1808_v10  ;;  %v924_v31 = vsel %vm873_vm3, %v908_v19, %v1809_v8 }
  0xea   : > { %v1804_v0 = vunpack.i.h.bf16 %v1802_v53  ;;  %v1803_v1 = vunpack.i.l.bf16 %v1802_v53 }
  0xec   : > { %v857_v11 = vsel %vm200_vm0, %v323_v54, %v1803_v1  ;;  %v858_v12 = vsel %vm200_vm0, %v324_v55, %v1804_v0  ;;  %v1822_v15 = vpop.permute.xlu1 %1821 }
  0xed   : > { %v1824_v20 = vunpack.i.h.bf16 %v1822_v15  ;;  %v1823_v21 = vunpack.i.l.bf16 %v1822_v15  ;;  %v1817_v22 = vpop.permute.xlu0 %1816  ;;  %v874_v26 = vsel %vm873_vm3, %v857_v11, %v1813_v63  ;;  %v875_v29 = vsel %vm873_vm3, %v858_v12, %v1814_v62 }
  0xee   : > { %v1819_v9 = vunpack.i.h.bf16 %v1817_v22  ;;  %v1818_v23 = vunpack.i.l.bf16 %v1817_v22 }
  0xef   : > { %v891_v51 = vsel %vm890_vm4, %v874_v26, %v1823_v21  ;;  %v892_v32 = vsel %vm890_vm4, %v875_v29, %v1824_v20 }
  0xf0   : > { %v1832_v52 = vpop.permute.xlu1 %1831  ;;  %v939_v35 = vsel %vm890_vm4, %v923_v30, %v1818_v23  ;;  %v940_v38 = vsel %vm890_vm4, %v924_v31, %v1819_v9  ;;  %v1621_v39 = vpack.c.bf16 %v892_v32, %v891_v51 }
  0xf1   : > { %v1827_v42 = vpop.permute.xlu0 %1826  ;;  %v1619_v43 = vpack.c.bf16 %v940_v38, %v939_v35  ;;  %v1834_v44 = vunpack.i.h.bf16 %v1832_v52  ;;  %v1833_v49 = vunpack.i.l.bf16 %v1832_v52 }
  0xf2   : > { %v1829_v53 = vunpack.i.h.bf16 %v1827_v42  ;;  %v1828_v54 = vunpack.i.l.bf16 %v1827_v42 }
  0xf3   : > { %1620 = vmatprep.subr.bf16.mxu0 %v1619_v43  ;;  %v859_v4 = vsel %vm200_vm0, %v2458_v45, %v1833_v49  ;;  %v860_v7 = vsel %vm200_vm0, %v2461_v46, %v1834_v44 }
  0xf4   : > { %1622 = vmatpush1.bf16.xpose.msra.mxu0 %v1621_v39  ;;  %v1842_v50 = vpop.permute.xlu1 %1841  ;;  %v910_v10 = vsel %vm200_vm0, %v2467_v48, %v1829_v53  ;;  %v909_v11 = vsel %vm200_vm0, %v2464_v47, %v1828_v54 }
  0xf5   : > { %v1837_v55 = vpop.permute.xlu0 %1836  ;;  %v1844_v62 = vunpack.i.h.bf16 %v1842_v50  ;;  %v1843_v63 = vunpack.i.l.bf16 %v1842_v50 }
  0xf6   : > { %v1839_v0 = vunpack.i.h.bf16 %v1837_v55  ;;  %v1838_v1 = vunpack.i.l.bf16 %v1837_v55 }
  0xf7   : > { %v876_v19 = vsel %vm873_vm3, %v859_v4, %v1843_v63  ;;  %v877_v20 = vsel %vm873_vm3, %v860_v7, %v1844_v62 }
  0xf8   : > { %v1852_v8 = vpop.permute.xlu1 %1851  ;;  %v925_v45 = vsel %vm873_vm3, %v909_v11, %v1838_v1  ;;  %v926_v46 = vsel %vm873_vm3, %v910_v10, %v1839_v0 }
  0xf9   : > { %v1854_v12 = vunpack.i.h.bf16 %v1852_v8  ;;  %v1853_v15 = vunpack.i.l.bf16 %v1852_v8  ;;  %v1847_v16 = vpop.permute.xlu0 %1846 }
  0xfa   : > { %v1849_v21 = vunpack.i.h.bf16 %v1847_v16  ;;  %v1848_v22 = vunpack.i.l.bf16 %v1847_v16 }
  0xfb   : > { %v893_v9 = vsel %vm890_vm4, %v876_v19, %v1853_v15  ;;  %v894_v48 = vsel %vm890_vm4, %v877_v20, %v1854_v12 }
  0xfc   : > { %v1862_v23 = vpop.permute.xlu1 %1861  ;;  %v941_v47 = vsel %vm890_vm4, %v925_v45, %v1848_v22  ;;  %v942_v26 = vsel %vm890_vm4, %v926_v46, %v1849_v21  ;;  %v1625_v29 = vpack.c.bf16 %v894_v48, %v893_v9 }
  0xfd   : > { %v1857_v30 = vpop.permute.xlu0 %1856  ;;  %v1623_v31 = vpack.c.bf16 %v942_v26, %v941_v47  ;;  %v1864_v51 = vunpack.i.h.bf16 %v1862_v23  ;;  %v1863_v32 = vunpack.i.l.bf16 %v1862_v23 }
  0xfe   : > { %v1859_v35 = vunpack.i.h.bf16 %v1857_v30  ;;  %v1858_v38 = vunpack.i.l.bf16 %v1857_v30 }
  0xff   : > { %1624 = vmatprep.subr.bf16.mxu0 %v1623_v31  ;;  %v861_v50 = vsel %vm200_vm0, %v2442_v33, %v1863_v32  ;;  %v862_v53 = vsel %vm200_vm0, %v2445_v34, %v1864_v51 }
 0x100   : > { %1626 = vmatpush1.bf16.xpose.msra.mxu0 %v1625_v29  ;;  %v1872_v52 = vpop.permute.xlu1 %1871  ;;  %v912_v55 = vsel %vm200_vm0, %v2501_v61, %v1859_v35  ;;  %v911_v62 = vsel %vm200_vm0, %v2498_v60, %v1858_v38 }
 0x101   : > { %v1867_v39 = vpop.permute.xlu0 %1866  ;;  %v1874_v42 = vunpack.i.h.bf16 %v1872_v52  ;;  %v1873_v43 = vunpack.i.l.bf16 %v1872_v52 }
 0x102   : > { %v1869_v44 = vunpack.i.h.bf16 %v1867_v39  ;;  %v1868_v49 = vunpack.i.l.bf16 %v1867_v39 }
 0x103   : > { %v878_v4 = vsel %vm873_vm3, %v861_v50, %v1873_v43  ;;  %v879_v7 = vsel %vm873_vm3, %v862_v53, %v1874_v42 }
 0x104   : > { %v1882_v54 = vpop.permute.xlu1 %1881  ;;  %v927_v33 = vsel %vm873_vm3, %v911_v62, %v1868_v49  ;;  %v928_v34 = vsel %vm873_vm3, %v912_v55, %v1869_v44 }
 0x105   : > { %v1884_v63 = vunpack.i.h.bf16 %v1882_v54  ;;  %v1883_v0 = vunpack.i.l.bf16 %v1882_v54  ;;  %v1877_v1 = vpop.permute.xlu0 %1876 }
 0x106   : > { %v1879_v8 = vunpack.i.h.bf16 %v1877_v1  ;;  %v1878_v10 = vunpack.i.l.bf16 %v1877_v1 }
 0x107   : > { %v895_v11 = vsel %vm890_vm4, %v878_v4, %v1883_v0  ;;  %v896_v61 = vsel %vm890_vm4, %v879_v7, %v1884_v63 }
 0x108   : > { %v1892_v12 = vpop.permute.xlu1 %1891  ;;  %v943_v60 = vsel %vm890_vm4, %v927_v33, %v1878_v10  ;;  %v944_v15 = vsel %vm890_vm4, %v928_v34, %v1879_v8  ;;  %v1629_v16 = vpack.c.bf16 %v896_v61, %v895_v11 }
 0x109   : > { %v1887_v19 = vpop.permute.xlu0 %1886  ;;  %v1627_v20 = vpack.c.bf16 %v944_v15, %v943_v60  ;;  %v1894_v21 = vunpack.i.h.bf16 %v1892_v12  ;;  %v1893_v22 = vunpack.i.l.bf16 %v1892_v12 }
 0x10a   : > { %v1889_v46 = vunpack.i.h.bf16 %v1887_v19  ;;  %v1888_v9 = vunpack.i.l.bf16 %v1887_v19 }
 0x10b   : > { %1628 = vmatprep.subr.bf16.mxu0 %v1627_v20  ;;  %v863_v30 = vsel %vm200_vm0, %v2488_v57, %v1893_v22  ;;  %v864_v31 = vsel %vm200_vm0, %v2491_v58, %v1894_v21 }
 0x10c   : > { %1630 = vmatpush1.bf16.xpose.msra.mxu0 %v1629_v16  ;;  %v1902_v45 = vpop.permute.xlu1 %1901  ;;  %v914_v32 = vsel %vm200_vm0, %v2525_v6, %v1889_v46  ;;  %v913_v52 = vsel %vm200_vm0, %v2522_v5, %v1888_v9 }
 0x10d   : > { %v1897_v48 = vpop.permute.xlu0 %1896  ;;  %v1904_v23 = vunpack.i.h.bf16 %v1902_v45  ;;  %v1903_v47 = vunpack.i.l.bf16 %v1902_v45 }
 0x10e   : > { %v1899_v26 = vunpack.i.h.bf16 %v1897_v48  ;;  %v1898_v29 = vunpack.i.l.bf16 %v1897_v48 }
 0x10f   : > { %v880_v42 = vsel %vm873_vm3, %v863_v30, %v1903_v47  ;;  %v881_v43 = vsel %vm873_vm3, %v864_v31, %v1904_v23 }
 0x110   : > { %v1912_v51 = vpop.permute.xlu1 %1911  ;;  %v929_v57 = vsel %vm873_vm3, %v913_v52, %v1898_v29  ;;  %v930_v58 = vsel %vm873_vm3, %v914_v32, %v1899_v26 }
 0x111   : > { %v1914_v35 = vunpack.i.h.bf16 %v1912_v51  ;;  %v1913_v38 = vunpack.i.l.bf16 %v1912_v51  ;;  %v1907_v39 = vpop.permute.xlu0 %1906 }
 0x112   : > { %v1909_v44 = vunpack.i.h.bf16 %v1907_v39  ;;  %v1908_v49 = vunpack.i.l.bf16 %v1907_v39 }
 0x113   : > { %v897_v50 = vsel %vm890_vm4, %v880_v42, %v1913_v38  ;;  %v898_v6 = vsel %vm890_vm4, %v881_v43, %v1914_v35 }
 0x114   : > { %v1922_v53 = vpop.permute.xlu1 %1921  ;;  %v945_v5 = vsel %vm890_vm4, %v929_v57, %v1908_v49  ;;  %v946_v54 = vsel %vm890_vm4, %v930_v58, %v1909_v44  ;;  %v1633_v55 = vpack.c.bf16 %v898_v6, %v897_v50 }
 0x115   : > { %v1917_v62 = vpop.permute.xlu0 %1916  ;;  %v1631_v63 = vpack.c.bf16 %v946_v54, %v945_v5  ;;  %v1924_v0 = vunpack.i.h.bf16 %v1922_v53  ;;  %v1923_v1 = vunpack.i.l.bf16 %v1922_v53 }
 0x116   : > { %v1919_v7 = vunpack.i.h.bf16 %v1917_v62  ;;  %v1918_v8 = vunpack.i.l.bf16 %v1917_v62 }
 0x117   : > { %1632 = vmatprep.subr.bf16.mxu0 %v1631_v63  ;;  %v865_v12 = vsel %vm200_vm0, %v2512_v2, %v1923_v1  ;;  %v866_v60 = vsel %vm200_vm0, %v2515_v3, %v1924_v0 }
 0x118   : > { %1634 = vmatpush1.bf16.xpose.msra.mxu0 %v1633_v55  ;;  %v1932_v4 = vpop.permute.xlu1 %1931  ;;  %v916_v16 = vsel %vm200_vm0, %v2559_v18, %v1919_v7  ;;  %v915_v19 = vsel %vm200_vm0, %v2556_v17, %v1918_v8 }
 0x119   : > { %v1927_v10 = vpop.permute.xlu0 %1926  ;;  %v1934_v33 = vunpack.i.h.bf16 %v1932_v4  ;;  %v1933_v34 = vunpack.i.l.bf16 %v1932_v4 }
 0x11a   : > { %v1929_v11 = vunpack.i.h.bf16 %v1927_v10  ;;  %v1928_v61 = vunpack.i.l.bf16 %v1927_v10 }
 0x11b   : > { %v882_v45 = vsel %vm873_vm3, %v865_v12, %v1933_v34  ;;  %v883_v46 = vsel %vm873_vm3, %v866_v60, %v1934_v33 }
 0x11c   : > { %v1942_v15 = vpop.permute.xlu1 %1941  ;;  %v931_v2 = vsel %vm873_vm3, %v915_v19, %v1928_v61  ;;  %v932_v3 = vsel %vm873_vm3, %v916_v16, %v1929_v11 }
 0x11d   : > { %v1944_v20 = vunpack.i.h.bf16 %v1942_v15  ;;  %v1943_v21 = vunpack.i.l.bf16 %v1942_v15  ;;  %v1937_v22 = vpop.permute.xlu0 %1936 }
 0x11e   : > { %v1939_v9 = vunpack.i.h.bf16 %v1937_v22  ;;  %v1938_v48 = vunpack.i.l.bf16 %v1937_v22 }
 0x11f   : > { %v899_v23 = vsel %vm890_vm4, %v882_v45, %v1943_v21  ;;  %v900_v18 = vsel %vm890_vm4, %v883_v46, %v1944_v20 }
 0x120   : > { %v1952_v47 = vpop.permute.xlu1 %1951  ;;  %v947_v17 = vsel %vm890_vm4, %v931_v2, %v1938_v48  ;;  %v948_v26 = vsel %vm890_vm4, %v932_v3, %v1939_v9  ;;  %v1637_v29 = vpack.c.bf16 %v900_v18, %v899_v23 }
 0x121   : > { %v1947_v30 = vpop.permute.xlu0 %1946  ;;  %v1635_v31 = vpack.c.bf16 %v948_v26, %v947_v17  ;;  %v1954_v51 = vunpack.i.h.bf16 %v1952_v47  ;;  %v1953_v32 = vunpack.i.l.bf16 %v1952_v47 }
 0x122   : > { %v1949_v35 = vunpack.i.h.bf16 %v1947_v30  ;;  %v1948_v38 = vunpack.i.l.bf16 %v1947_v30 }
 0x123   : > { %1636 = vmatprep.subr.bf16.mxu0 %v1635_v31  ;;  %v867_v57 = vsel %vm200_vm0, %v2546_v13, %v1953_v32  ;;  %v868_v58 = vsel %vm200_vm0, %v2549_v14, %v1954_v51 }
 0x124   : > { %1638 = vmatpush1.bf16.xpose.msra.mxu0 %v1637_v29  ;;  %v1962_v52 = vpop.permute.xlu1 %1961  ;;  %v918_v6 = vsel %vm200_vm0, %v2591_v28, %v1949_v35  ;;  %v917_v53 = vsel %vm200_vm0, %v2588_v27, %v1948_v38 }
 0x125   : > { %v1957_v39 = vpop.permute.xlu0 %1956  ;;  %v1964_v42 = vunpack.i.h.bf16 %v1962_v52  ;;  %v1963_v43 = vunpack.i.l.bf16 %v1962_v52 }
 0x126   : > { %v1959_v44 = vunpack.i.h.bf16 %v1957_v39  ;;  %v1958_v49 = vunpack.i.l.bf16 %v1957_v39 }
 0x127   : > { %v884_v62 = vsel %vm873_vm3, %v867_v57, %v1963_v43  ;;  %v885_v63 = vsel %vm873_vm3, %v868_v58, %v1964_v42 }
 0x128   : > { %v1972_v50 = vpop.permute.xlu1 %1971  ;;  %v933_v13 = vsel %vm873_vm3, %v917_v53, %v1958_v49  ;;  %v934_v14 = vsel %vm873_vm3, %v918_v6, %v1959_v44 }
 0x129   : > { %v1974_v5 = vunpack.i.h.bf16 %v1972_v50  ;;  %v1973_v54 = vunpack.i.l.bf16 %v1972_v50  ;;  %v1967_v55 = vpop.permute.xlu0 %1966 }
 0x12a   : > { %v1969_v0 = vunpack.i.h.bf16 %v1967_v55  ;;  %v1968_v1 = vunpack.i.l.bf16 %v1967_v55 }
 0x12b   : > { %v901_v4 = vsel %vm890_vm4, %v884_v62, %v1973_v54  ;;  %v902_v28 = vsel %vm890_vm4, %v885_v63, %v1974_v5 }
 0x12c   : > { %v1982_v7 = vpop.permute.xlu1 %1981  ;;  %v949_v27 = vsel %vm890_vm4, %v933_v13, %v1968_v1  ;;  %v950_v8 = vsel %vm890_vm4, %v934_v14, %v1969_v0  ;;  %v1641_v10 = vpack.c.bf16 %v902_v28, %v901_v4 }
 0x12d   : > { %v1977_v33 = vpop.permute.xlu0 %1976  ;;  %v1639_v34 = vpack.c.bf16 %v950_v8, %v949_v27  ;;  %v1984_v11 = vunpack.i.h.bf16 %v1982_v7  ;;  %v1983_v61 = vunpack.i.l.bf16 %v1982_v7 }
 0x12e   : > { %v1979_v60 = vunpack.i.h.bf16 %v1977_v33  ;;  %v1978_v15 = vunpack.i.l.bf16 %v1977_v33  ;;  %v955_v33 = vld [vmem:[%s2934_s1] sm:$0xff] }
 0x12f   : > { %1640 = vmatprep.subr.bf16.mxu0 %v1639_v34  ;;  %v869_v45 = vsel %vm200_vm0, %v2574_v24, %v1983_v61  ;;  %v870_v46 = vsel %vm200_vm0, %v2577_v25, %v1984_v11  ;;  %v959_v34 = vld [vmem:[%s2934_s1 + $0x20] sm:$0xff]  ;;  %v958_v11 = vld [vmem:[%s2934_s1 + $0x18] sm:$0xff] }
 0x130   : > { %1642 = vmatpush1.bf16.xpose.msra.mxu0 %v1641_v10  ;;  %v1992_v12 = vpop.permute.xlu1 %1991  ;;  %v920_v48 = vsel %vm200_vm0, %v2619_v41, %v1979_v60  ;;  %v919_v2 = vsel %vm200_vm0, %v2616_v40, %v1978_v15  ;;  %v962_v61 = vld [vmem:[%s2934_s1 + $0x38] sm:$0xff]  ;;  %v965_v60 = vld [vmem:[%s2934_s1 + $0x50] sm:$0xff]  ;;  %v964_v15 = vld [vmem:[%s2934_s1 + $0x48] sm:$0xff] }
 0x131   : > { %v1987_v16 = vpop.permute.xlu0 %1986  ;;  %v1994_v19 = vunpack.i.h.bf16 %v1992_v12  ;;  %v1993_v20 = vunpack.i.l.bf16 %v1992_v12  ;;  %v961_v12 = vld [vmem:[%s2934_s1 + $0x30] sm:$0xff] }
 0x132   : > { %v1989_v21 = vunpack.i.h.bf16 %v1987_v16  ;;  %v1988_v22 = vunpack.i.l.bf16 %v1987_v16  ;;  %v968_v16 = vld [vmem:[%s2934_s1 + $0x68] sm:$0xff] }
 0x133   : > { %v886_v47 = vsel %vm873_vm3, %v869_v45, %v1993_v20  ;;  %v887_v17 = vsel %vm873_vm3, %v870_v46, %v1994_v19  ;;  %v967_v19 = vld [vmem:[%s2934_s1 + $0x60] sm:$0xff] }
 0x134   : > { %v2002_v9 = vpop.permute.xlu1 %2001  ;;  %v935_v24 = vsel %vm873_vm3, %v919_v2, %v1988_v22  ;;  %v936_v25 = vsel %vm873_vm3, %v920_v48, %v1989_v21  ;;  %v971_v20 = vld [vmem:[%s2934_s1 + $0x80] sm:$0xff]  ;;  %v970_v21 = vld [vmem:[%s2934_s1 + $0x78] sm:$0xff] }
 0x135   : > { %v2004_v3 = vunpack.i.h.bf16 %v2002_v9  ;;  %v2003_v23 = vunpack.i.l.bf16 %v2002_v9  ;;  %v1997_v18 = vpop.permute.xlu0 %1996 }
 0x136   : > { %v1999_v26 = vunpack.i.h.bf16 %v1997_v18  ;;  %v1998_v29 = vunpack.i.l.bf16 %v1997_v18 }
 0x137   : > { %v903_v30 = vsel %vm890_vm4, %v886_v47, %v2003_v23  ;;  %v904_v41 = vsel %vm890_vm4, %v887_v17, %v2004_v3 }
 0x138   : > { %v2012_v31 = vpop.permute.xlu1 %2011  ;;  %v951_v40 = vsel %vm890_vm4, %v935_v24, %v1998_v29  ;;  %v952_v51 = vsel %vm890_vm4, %v936_v25, %v1999_v26  ;;  %v1645_v32 = vpack.c.bf16 %v904_v41, %v903_v30 }
 0x139   : > { %v2007_v52 = vpop.permute.xlu0 %2006  ;;  %v1643_v35 = vpack.c.bf16 %v952_v51, %v951_v40  ;;  %v2014_v38 = vunpack.i.h.bf16 %v2012_v31  ;;  %v2013_v39 = vunpack.i.l.bf16 %v2012_v31 }
 0x13a   : > { %v2009_v43 = vunpack.i.h.bf16 %v2007_v52  ;;  %v2008_v44 = vunpack.i.l.bf16 %v2007_v52 }
 0x13b   : > { %1644 = vmatprep.subr.bf16.mxu0 %v1643_v35  ;;  %v871_v53 = vsel %vm200_vm0, %v2606_v36, %v2013_v39  ;;  %v872_v5 = vsel %vm200_vm0, %v2609_v37, %v2014_v38 }
 0x13c   : > { %1646 = vmatpush1.bf16.xpose.msra.mxu0 %v1645_v32  ;;  %v2022_v42 = vpop.permute.xlu1 %2021  ;;  %v922_v55 = vsel %vm200_vm0, %v2645_v59, %v2009_v43  ;;  %v921_v62 = vsel %vm200_vm0, %v2642_v56, %v2008_v44 }
 0x13d   : > { %v2017_v49 = vpop.permute.xlu0 %2016  ;;  %v2024_v57 = vunpack.i.h.bf16 %v2022_v42  ;;  %v2023_v58 = vunpack.i.l.bf16 %v2022_v42 }
 0x13e   : > { %v2019_v50 = vunpack.i.h.bf16 %v2017_v49  ;;  %v2018_v6 = vunpack.i.l.bf16 %v2017_v49 }
 0x13f   : > { %v888_v13 = vsel %vm873_vm3, %v871_v53, %v2023_v58  ;;  %v889_v14 = vsel %vm873_vm3, %v872_v5, %v2024_v57 }
 0x140   : > { %v2032_v54 = vpop.permute.xlu1 %2031  ;;  %v937_v36 = vsel %vm873_vm3, %v921_v62, %v2018_v6  ;;  %v938_v37 = vsel %vm873_vm3, %v922_v55, %v2019_v50 }
 0x141   : > { %v2034_v63 = vunpack.i.h.bf16 %v2032_v54  ;;  %v2033_v0 = vunpack.i.l.bf16 %v2032_v54  ;;  %v2027_v1 = vpop.permute.xlu0 %2026 }
 0x142   : > { %v2029_v4 = vunpack.i.h.bf16 %v2027_v1  ;;  %v2028_v28 = vunpack.i.l.bf16 %v2027_v1 }
 0x143   : > { %v905_v7 = vsel %vm890_vm4, %v888_v13, %v2033_v0  ;;  %v906_v59 = vsel %vm890_vm4, %v889_v14, %v2034_v63 }
 0x144   : > { %v953_v27 = vsel %vm890_vm4, %v937_v36, %v2028_v28  ;;  %v954_v56 = vsel %vm890_vm4, %v938_v37, %v2029_v4  ;;  %v1649_v8 = vpack.c.bf16 %v906_v59, %v905_v7 }
 0x145   : > { %v1647_v10 = vpack.c.bf16 %v954_v56, %v953_v27 }
 0x147   : > { %1648 = vmatprep.subr.bf16.mxu0 %v1647_v10 }
 0x148   : > { %1650 = vmatpush1.bf16.xpose.msra.mxu0 %v1649_v8 }
 0x14f   : > { %1140 = vmatmul.mubr.f32.vlgmr.msra.gmra.mrb[0].mxu0 %v955_v33 }
 0x150   : > { %1144 = vmatprep.mubr.f32.mxu0 %v959_v34 }
 0x151   : > { %v987_v18 = vpop.permute.xlu1 %986 }
 0x152   : > { %v982_v3 = vpop.permute.xlu0 %981 }
 0x153   : > { %1145 = vmatmul.mubr.f32.gmra.mrb[2].mxu0 %v958_v11 }
 0x154   : > { %1149 = vmatprep.mubr.f32.mxu0 %v962_v61 }
 0x155   : > { %v992_v30 = vpop.permute.xlu1 %991 }
 0x156   : > { %v997_v52 = vpop.permute.xlu0 %996 }
 0x157   : > { %1150 = vmatmul.mubr.f32.gmra.mrb[4].mxu0 %v961_v12 }
 0x158   : > { %1154 = vmatprep.mubr.f32.mxu0 %v965_v60 }
 0x159   : > { %v1002_v43 = vpop.permute.xlu1 %1001 }
 0x15a   : > { %v1007_v50 = vpop.permute.xlu0 %1006 }
 0x15b   : > { %1155 = vmatmul.mubr.f32.gmra.mrb[6].mxu0 %v964_v15 }
 0x15c   : > { %1159 = vmatprep.mubr.f32.mxu0 %v968_v16 }
 0x15f   : > { %1160 = vmatmul.mubr.f32.gmra.mrb[8].mxu0 %v967_v19 }
 0x160   : > { %1164 = vmatprep.mubr.f32.mxu0 %v971_v20 }
 0x163   : > { %1165 = vmatmul.mubr.f32.gmra.mrb[10].mxu0 %v970_v21 }
 0x18b   : > { %v1612_v22 = vpop.f32.mrb[0].mxu1 }
 0x18c   : > { %v1236_v45 = vpop.f32.mrb[1].mxu1 }
 0x18f   : > { %v1615_v46 = vpop.f32.mrb[2].mxu1 }
 0x190   : > { %v1246_v9 = vpop.f32.mrb[3].mxu1 }
 0x193   : > { %v1618_v48 = vpop.f32.mrb[4].mxu1 }
 0x194   : > { %v1256_v2 = vpop.f32.mrb[5].mxu1 }
 0x222   : > { %v1141_v23 = vpop.f32.mrb[0].mxu0 }
 0x223   : > { %v1142_v47 = vadd.f32 %v1141_v23, %v982_v3  ;;  %v1143_v17 = vpop.f32.mrb[1].mxu0 }
 0x225   : > { %v1237_v26 = vadd.f32 %v1236_v45, %v1142_v47 }
 0x226   : > { %v1146_v29 = vpop.f32.mrb[2].mxu0 }
 0x227   : > { %1265 = vst [vmem:[%s2882_s24] sm:$0xff] %v1237_v26  ;;  %v1147_v24 = vadd.f32 %v1146_v29, %v987_v18  ;;  %v1148_v25 = vpop.f32.mrb[3].mxu0 }
 0x229   : > { %v1242_v41 = vadd.f32 %v1612_v22, %v1147_v24 }
 0x22a   : > { %v1151_v31 = vpop.f32.mrb[4].mxu0 }
 0x22b   : > { %1266 = vst [vmem:[%s2882_s24 + $0x8] sm:$0xff] %v1242_v41  ;;  %v1152_v40 = vadd.f32 %v1151_v31, %v992_v30  ;;  %v1153_v51 = vpop.f32.mrb[5].mxu0 }
 0x22d   : > { %v1247_v32 = vadd.f32 %v1246_v9, %v1152_v40 }
 0x22e   : > { %v1156_v35 = vpop.f32.mrb[6].mxu0  ;;  %v1319_v55 = vld [vmem:[%s2882_s24] sm:$0xff] (%p2946_p7) }
 0x22f   : > { %1267 = vst [vmem:[%s2882_s24 + $0x10] sm:$0xff] %v1247_v32  ;;  %v1157_v38 = vadd.f32 %v1156_v35, %v997_v52  ;;  %v1158_v39 = vpop.f32.mrb[7].mxu0  ;;  %1320 = vst [vmem:[%s1281_s28] sm:$0xff] (%p2946_p7), %v1319_v55 }
 0x231   : > { %v1252_v42 = vadd.f32 %v1615_v46, %v1157_v38 }
 0x232   : > { %v1161_v44 = vpop.f32.mrb[8].mxu0  ;;  %v1321_v62 = vld [vmem:[%s2882_s24 + $0x8] sm:$0xff] (%p2946_p7) }
 0x233   : > { %1268 = vst [vmem:[%s2882_s24 + $0x18] sm:$0xff] %v1252_v42  ;;  %v1162_v49 = vadd.f32 %v1161_v44, %v1002_v43  ;;  %v1163_v57 = vpop.f32.mrb[9].mxu0  ;;  %1322 = vst [vmem:[%s1281_s28 + $0x10] sm:$0xff] (%p2946_p7), %v1321_v62 }
 0x235   : > { %v1257_v58 = vadd.f32 %v1256_v2, %v1162_v49  ;;  %1277 = sbr.rel (!%p2946_p7) target bundleno = 580 (0x244), region = 40 }
 0x236   : > { %v1166_v6 = vpop.f32.mrb[10].mxu0  ;;  %v1323_v63 = vld [vmem:[%s2882_s24 + $0x10] sm:$0xff] (%p2946_p7) }
 0x237   : > { %1269 = vst [vmem:[%s2882_s24 + $0x20] sm:$0xff] %v1257_v58  ;;  %v1167_v53 = vadd.f32 %v1166_v6, %v1007_v50  ;;  %v1168_v5 = vpop.f32.mrb[11].mxu0  ;;  %1324 = vst [vmem:[%s1281_s28 + $0x20] sm:$0xff] (%p2946_p7), %v1323_v63 }
 0x239   : > { %v1262_v54 = vadd.f32 %v1618_v48, %v1167_v53 }
 0x23a   : > { %v1325_v0 = vld [vmem:[%s2882_s24 + $0x18] sm:$0xff] (%p2946_p7) }
 0x23b   : > { %1270 = vst [vmem:[%s2882_s24 + $0x28] sm:$0xff] %v1262_v54  ;;  %1326 = vst [vmem:[%s1281_s28 + $0x30] sm:$0xff] (%p2946_p7), %v1325_v0 }
 0x23e   : > { %v1327_v1 = vld [vmem:[%s2882_s24 + $0x20] sm:$0xff] }
 0x23f   : > { %1328 = vst [vmem:[%s1281_s28 + $0x40] sm:$0xff] %v1327_v1 }
 0x242   : > { %v1329_v13 = vld [vmem:[%s2882_s24 + $0x28] sm:$0xff] }
 0x243   : > { %1330 = vst [vmem:[%s1281_s28 + $0x50] sm:$0xff] %v1329_v13 }
 0x244 PF: > { %s16_s21 = sadd.s32 1, %s2149_s21   ;;  %s2947_s22 = sld [smem:[#allocation7_spill]] }
 0x245   : > { %p13_p12 = scmp.ge.s32.totalorder %s16_s21, 6   ;;  %s2948_s12 = smov %s2117_s13 }
 0x246   : > { %s2949_s13 = smov %s2259_s6  ;;  %s2950_s14 = smov %s2125_s15 }
 0x247   : > { %s2951_s15 = smov %s2129_s16  ;;  %s2952_s16 = smov %s2256_s5 }
 0x248   : > { %s2953_s17 = smov %s2141_s19  ;;  %s2954_s18 = smov %s2145_s20 }
 0x249   : > { %s2955_s19 = smov %s2958_s23  ;;  %15 = sbr.rel (!%p13_p12) target bundleno = 6 (0x6), region = 114 }
 0x24a   : > { %s2956_s20 = smov %s2947_s22 }
 0x250   :  { %1346 = vsyncpa [#allocation4], 1 }
 0x251   :  { %1348 = vsyncpa [#allocation4 + $0x1], 1 }

</bundles_post_ra>
